<compile_context>
chip_gen: v5e
topology: v5e:2x2
jax: 0.10.0
libtpu: 0.0.40
codegen_flags: <defaults>
</compile_context>

<pallas_src>
import functools

import jax
import jax.numpy as jnp
from jax.experimental import pallas as pl
from jax.experimental.pallas import tpu as pltpu


def rnn_kernel(x_ref, p_ref, out_ref, *, seq_len, batch, input_size, hidden):
    T, B, I, H = seq_len, batch, input_size, hidden

    # Static row offsets inside the packed parameter slab (all 8-row aligned).
    r_hh = 8
    r_b = r_hh + H
    r_fc = r_b + 8
    r_bf = r_fc + H

    wih = p_ref[0:I, :H]              # (I, H)   W_ih^T
    whh = p_ref[r_hh:r_hh + H, :H]    # (H, H)   W_hh^T
    b = p_ref[r_b:r_b + 1, :H]        # (1, H)   b_ih + b_hh
    wfc = p_ref[r_fc:r_fc + H, :]     # (H, 128) W_fc^T zero-padded to full lane width
    bfc = p_ref[r_bf:r_bf + 1, :]     # (1, 128) b_fc zero-padded

    # ---- Hoisted input projection: one MXU push for all (b, t) rows ---------
    xproj = jnp.dot(x_ref[...], wih, preferred_element_type=jnp.float32) + b  # (B*T, H)
    xproj = xproj.reshape(B, T, H)    # batch-major, tile-aligned regroup of the sublane dim

    # ---- Serial recurrence, fully unrolled (T small & static) ---------------
    # h and its history live in vregs; no VMEM round-trips in the serial chain.
    h = jnp.zeros((B, H), jnp.float32)
    hs = []
    for t in range(T):
        pre = xproj[:, t, :] + jnp.dot(h, whh, preferred_element_type=jnp.float32)
        h = jnp.tanh(pre)
        hs.append(h)

    # Batch-major history: row (b*T + t) = h_t[b]  ->  wrapper needs no transpose.
    h_all = jnp.stack(hs, axis=1).reshape(B * T, H)

    # ---- Hoisted FC head: one matmul + one unmasked, lane-dense store -------
    y = jnp.dot(h_all, wfc, preferred_element_type=jnp.float32) + bfc         # (B*T, 128)
    out_ref[...] = y.astype(out_ref.dtype)


def pack_params(params):
    """One-time packing of all weights/biases into a single (24+2H, 128) slab.

    One VMEM operand -> one prologue DMA instead of five tiny (8,128)-padded
    ones; W_fc^T / b_fc are zero-padded to a full 128-lane tile so the kernel's
    output store is unmasked.  Call this once per parameter set, outside the
    per-forward path.
    """
    H = params["w_hh"].shape[0]
    I = params["w_ih"].shape[1]
    O = params["w_fc"].shape[0]
    assert H <= 128 and O <= 128 and I <= 8
    p = jnp.zeros((24 + 2 * H, 128), jnp.float32)
    p = p.at[0:I, :H].set(params["w_ih"].T)                       # W_ih^T
    p = p.at[8:8 + H, :H].set(params["w_hh"].T)                   # W_hh^T
    p = p.at[8 + H, :H].set(params["b_ih"] + params["b_hh"])      # combined RNN bias
    p = p.at[16 + H:16 + 2 * H, :O].set(params["w_fc"].T)         # W_fc^T (lane-padded)
    p = p.at[16 + 2 * H, :O].set(params["b_fc"])                  # b_fc   (lane-padded)
    return p
    # TODO(synk): on v6e/v7x cast x and the packed slab to bf16 here (keep f32
    # accumulation + tanh in-kernel); skip on v5e where bf16 VPU/EUP paths are absent.


def simple_rnn_forward(x, packed, *, hidden_size, output_size):
    """x: (B, T, I) float32, batch_first like the PyTorch module."""
    B, T, I = x.shape
    H, O = hidden_size, output_size

    x_flat = x.reshape(B * T, I)      # contiguous reshape only — no transpose / HBM shuffle

    out_pad = pl.pallas_call(
        functools.partial(rnn_kernel, seq_len=T, batch=B, input_size=I, hidden=H),
        out_shape=jax.ShapeDtypeStruct((B * T, 128), x.dtype),
        in_specs=[pl.BlockSpec(memory_space=pltpu.MemorySpace.VMEM)] * 2,
        out_specs=pl.BlockSpec(memory_space=pltpu.MemorySpace.VMEM),
    )(x_flat, packed)

    # TODO(synk): if B/T grow, add a leading "parallel" batch grid axis (2 TCs on
    # v7x) and switch the unrolled T loop to lax.fori_loop with time-tiled xproj.
    return out_pad[:, :O].reshape(B, T, O)   # already batch-major; drop lane padding


def reference_forward(x, params):
    """Pure-JAX reference (lax.scan) with identical semantics."""
    B = x.shape[0]
    H = params["w_hh"].shape[0]
    x_tbi = jnp.transpose(x, (1, 0, 2))

    def step(h, x_t):
        h_new = jnp.tanh(
            x_t @ params["w_ih"].T + params["b_ih"]
            + h @ params["w_hh"].T + params["b_hh"]
        )
        y = h_new @ params["w_fc"].T + params["b_fc"]
        return h_new, y

    _, ys = jax.lax.scan(step, jnp.zeros((B, H), jnp.float32), x_tbi)
    return jnp.transpose(ys, (1, 0, 2))


def init_params(key, input_size, hidden_size, output_size):
    """Deterministic init matching PyTorch shapes (uniform +-1/sqrt(H))."""
    ks = jax.random.split(key, 6)
    s = 1.0 / jnp.sqrt(hidden_size)
    return {
        "w_ih": jax.random.uniform(ks[0], (hidden_size, input_size), jnp.float32, -s, s),
        "w_hh": jax.random.uniform(ks[1], (hidden_size, hidden_size), jnp.float32, -s, s),
        "b_ih": jax.random.uniform(ks[2], (hidden_size,), jnp.float32, -s, s),
        "b_hh": jax.random.uniform(ks[3], (hidden_size,), jnp.float32, -s, s),
        "w_fc": jax.random.uniform(ks[4], (output_size, hidden_size), jnp.float32, -s, s),
        "b_fc": jax.random.uniform(ks[5], (output_size,), jnp.float32, -s, s),
    }


if __name__ == "__main__":
    input_size = 4
    hidden_size = 64
    output_size = 4
    batch = 2
    seq_len = 8

    key = jax.random.PRNGKey(0)
    k_x, k_p = jax.random.split(key)
    x = jax.random.normal(k_x, (batch, seq_len, input_size), jnp.float32)
    params = init_params(k_p, input_size, hidden_size, output_size)

    packed = pack_params(params)   # one-time preprocessing, hoisted out of the call path
    fwd = jax.jit(functools.partial(
        simple_rnn_forward, hidden_size=hidden_size, output_size=output_size))

    out = jax.block_until_ready(fwd(x, packed))
    ref = jax.block_until_ready(reference_forward(x, params))

    assert out.shape == (batch, seq_len, output_size)
    assert jnp.allclose(out, ref, atol=1e-5, rtol=1e-5)

    print("KERNEL_OK")
</pallas_src>

<mosaic_0001>
module attributes {stable_mosaic.version = 11 : i64} {
  func.func @rnn_kernel(%arg0: memref<16x4xf32, #tpu.memory_space<vmem>>, %arg1: memref<152x128xf32, #tpu.memory_space<vmem>>, %arg2: memref<16x128xf32, #tpu.memory_space<vmem>>) attributes {dimension_semantics = [], scalar_prefetch = 0 : i64, scratch_operands = 0 : i64, tpu.core_type = #tpu.core_type<tc>} {
    %c0 = arith.constant 0 : index
    %c0_0 = arith.constant 0 : index
    %0 = vector.load %arg1[%c0, %c0_0] : memref<152x128xf32, #tpu.memory_space<vmem>>, vector<4x64xf32>
    %c8 = arith.constant 8 : index
    %c0_1 = arith.constant 0 : index
    %1 = vector.load %arg1[%c8, %c0_1] : memref<152x128xf32, #tpu.memory_space<vmem>>, vector<64x64xf32>
    %c72 = arith.constant 72 : index
    %c0_2 = arith.constant 0 : index
    %2 = vector.load %arg1[%c72, %c0_2] : memref<152x128xf32, #tpu.memory_space<vmem>>, vector<1x64xf32>
    %c80 = arith.constant 80 : index
    %c0_3 = arith.constant 0 : index
    %3 = vector.load %arg1[%c80, %c0_3] : memref<152x128xf32, #tpu.memory_space<vmem>>, vector<64x128xf32>
    %c144 = arith.constant 144 : index
    %c0_4 = arith.constant 0 : index
    %4 = vector.load %arg1[%c144, %c0_4] : memref<152x128xf32, #tpu.memory_space<vmem>>, vector<1x128xf32>
    %c0_5 = arith.constant 0 : index
    %c0_6 = arith.constant 0 : index
    %5 = vector.load %arg0[%c0_5, %c0_6] : memref<16x4xf32, #tpu.memory_space<vmem>>, vector<16x4xf32>
    %cst = arith.constant dense<0.000000e+00> : vector<16x64xf32>
    %6 = tpu.matmul %5, %0, %cst {dimension_numbers = #tpu.dot_dimension_numbers<[1], [0], [0], [1], [0, 0, 1, 1], [], []>} : vector<16x4xf32>, vector<4x64xf32>, vector<16x64xf32> -> vector<16x64xf32>
    %7 = vector.broadcast %2 : vector<1x64xf32> to vector<16x64xf32>
    %8 = arith.addf %6, %7 : vector<16x64xf32>
    %9 = vector.shape_cast %8 : vector<16x64xf32> to vector<2x8x64xf32>
    %cst_7 = arith.constant 0.000000e+00 : f32
    %10 = vector.broadcast %cst_7 : f32 to vector<2x64xf32>
    %11 = vector.extract_strided_slice %9 {offsets = [0, 0, 0], sizes = [2, 1, 64], strides = [1, 1, 1]} : vector<2x8x64xf32> to vector<2x1x64xf32>
    %12 = vector.shape_cast %11 : vector<2x1x64xf32> to vector<2x64xf32>
    %cst_8 = arith.constant dense<0.000000e+00> : vector<2x64xf32>
    %13 = tpu.matmul %10, %1, %cst_8 {dimension_numbers = #tpu.dot_dimension_numbers<[1], [0], [0], [1], [0, 0, 1, 1], [], []>} : vector<2x64xf32>, vector<64x64xf32>, vector<2x64xf32> -> vector<2x64xf32>
    %14 = arith.addf %12, %13 : vector<2x64xf32>
    %15 = math.tanh %14 : vector<2x64xf32>
    %16 = vector.extract_strided_slice %9 {offsets = [0, 1, 0], sizes = [2, 1, 64], strides = [1, 1, 1]} : vector<2x8x64xf32> to vector<2x1x64xf32>
    %17 = vector.shape_cast %16 : vector<2x1x64xf32> to vector<2x64xf32>
    %cst_9 = arith.constant dense<0.000000e+00> : vector<2x64xf32>
    %18 = tpu.matmul %15, %1, %cst_9 {dimension_numbers = #tpu.dot_dimension_numbers<[1], [0], [0], [1], [0, 0, 1, 1], [], []>} : vector<2x64xf32>, vector<64x64xf32>, vector<2x64xf32> -> vector<2x64xf32>
    %19 = arith.addf %17, %18 : vector<2x64xf32>
    %20 = math.tanh %19 : vector<2x64xf32>
    %21 = vector.extract_strided_slice %9 {offsets = [0, 2, 0], sizes = [2, 1, 64], strides = [1, 1, 1]} : vector<2x8x64xf32> to vector<2x1x64xf32>
    %22 = vector.shape_cast %21 : vector<2x1x64xf32> to vector<2x64xf32>
    %cst_10 = arith.constant dense<0.000000e+00> : vector<2x64xf32>
    %23 = tpu.matmul %20, %1, %cst_10 {dimension_numbers = #tpu.dot_dimension_numbers<[1], [0], [0], [1], [0, 0, 1, 1], [], []>} : vector<2x64xf32>, vector<64x64xf32>, vector<2x64xf32> -> vector<2x64xf32>
    %24 = arith.addf %22, %23 : vector<2x64xf32>
    %25 = math.tanh %24 : vector<2x64xf32>
    %26 = vector.extract_strided_slice %9 {offsets = [0, 3, 0], sizes = [2, 1, 64], strides = [1, 1, 1]} : vector<2x8x64xf32> to vector<2x1x64xf32>
    %27 = vector.shape_cast %26 : vector<2x1x64xf32> to vector<2x64xf32>
    %cst_11 = arith.constant dense<0.000000e+00> : vector<2x64xf32>
    %28 = tpu.matmul %25, %1, %cst_11 {dimension_numbers = #tpu.dot_dimension_numbers<[1], [0], [0], [1], [0, 0, 1, 1], [], []>} : vector<2x64xf32>, vector<64x64xf32>, vector<2x64xf32> -> vector<2x64xf32>
    %29 = arith.addf %27, %28 : vector<2x64xf32>
    %30 = math.tanh %29 : vector<2x64xf32>
    %31 = vector.extract_strided_slice %9 {offsets = [0, 4, 0], sizes = [2, 1, 64], strides = [1, 1, 1]} : vector<2x8x64xf32> to vector<2x1x64xf32>
    %32 = vector.shape_cast %31 : vector<2x1x64xf32> to vector<2x64xf32>
    %cst_12 = arith.constant dense<0.000000e+00> : vector<2x64xf32>
    %33 = tpu.matmul %30, %1, %cst_12 {dimension_numbers = #tpu.dot_dimension_numbers<[1], [0], [0], [1], [0, 0, 1, 1], [], []>} : vector<2x64xf32>, vector<64x64xf32>, vector<2x64xf32> -> vector<2x64xf32>
    %34 = arith.addf %32, %33 : vector<2x64xf32>
    %35 = math.tanh %34 : vector<2x64xf32>
    %36 = vector.extract_strided_slice %9 {offsets = [0, 5, 0], sizes = [2, 1, 64], strides = [1, 1, 1]} : vector<2x8x64xf32> to vector<2x1x64xf32>
    %37 = vector.shape_cast %36 : vector<2x1x64xf32> to vector<2x64xf32>
    %cst_13 = arith.constant dense<0.000000e+00> : vector<2x64xf32>
    %38 = tpu.matmul %35, %1, %cst_13 {dimension_numbers = #tpu.dot_dimension_numbers<[1], [0], [0], [1], [0, 0, 1, 1], [], []>} : vector<2x64xf32>, vector<64x64xf32>, vector<2x64xf32> -> vector<2x64xf32>
    %39 = arith.addf %37, %38 : vector<2x64xf32>
    %40 = math.tanh %39 : vector<2x64xf32>
    %41 = vector.extract_strided_slice %9 {offsets = [0, 6, 0], sizes = [2, 1, 64], strides = [1, 1, 1]} : vector<2x8x64xf32> to vector<2x1x64xf32>
    %42 = vector.shape_cast %41 : vector<2x1x64xf32> to vector<2x64xf32>
    %cst_14 = arith.constant dense<0.000000e+00> : vector<2x64xf32>
    %43 = tpu.matmul %40, %1, %cst_14 {dimension_numbers = #tpu.dot_dimension_numbers<[1], [0], [0], [1], [0, 0, 1, 1], [], []>} : vector<2x64xf32>, vector<64x64xf32>, vector<2x64xf32> -> vector<2x64xf32>
    %44 = arith.addf %42, %43 : vector<2x64xf32>
    %45 = math.tanh %44 : vector<2x64xf32>
    %46 = vector.extract_strided_slice %9 {offsets = [0, 7, 0], sizes = [2, 1, 64], strides = [1, 1, 1]} : vector<2x8x64xf32> to vector<2x1x64xf32>
    %47 = vector.shape_cast %46 : vector<2x1x64xf32> to vector<2x64xf32>
    %cst_15 = arith.constant dense<0.000000e+00> : vector<2x64xf32>
    %48 = tpu.matmul %45, %1, %cst_15 {dimension_numbers = #tpu.dot_dimension_numbers<[1], [0], [0], [1], [0, 0, 1, 1], [], []>} : vector<2x64xf32>, vector<64x64xf32>, vector<2x64xf32> -> vector<2x64xf32>
    %49 = arith.addf %47, %48 : vector<2x64xf32>
    %50 = math.tanh %49 : vector<2x64xf32>
    %51 = vector.shape_cast %15 : vector<2x64xf32> to vector<2x1x64xf32>
    %52 = vector.shape_cast %20 : vector<2x64xf32> to vector<2x1x64xf32>
    %53 = vector.shape_cast %25 : vector<2x64xf32> to vector<2x1x64xf32>
    %54 = vector.shape_cast %30 : vector<2x64xf32> to vector<2x1x64xf32>
    %55 = vector.shape_cast %35 : vector<2x64xf32> to vector<2x1x64xf32>
    %56 = vector.shape_cast %40 : vector<2x64xf32> to vector<2x1x64xf32>
    %57 = vector.shape_cast %45 : vector<2x64xf32> to vector<2x1x64xf32>
    %58 = vector.shape_cast %50 : vector<2x64xf32> to vector<2x1x64xf32>
    %59 = tpu.concatenate %51, %52, %53, %54, %55, %56, %57, %58 in 1 : vector<2x1x64xf32>, vector<2x1x64xf32>, vector<2x1x64xf32>, vector<2x1x64xf32>, vector<2x1x64xf32>, vector<2x1x64xf32>, vector<2x1x64xf32>, vector<2x1x64xf32> -> vector<2x8x64xf32>
    %60 = vector.shape_cast %59 : vector<2x8x64xf32> to vector<16x64xf32>
    %cst_16 = arith.constant dense<0.000000e+00> : vector<16x128xf32>
    %61 = tpu.matmul %60, %3, %cst_16 {dimension_numbers = #tpu.dot_dimension_numbers<[1], [0], [0], [1], [0, 0, 1, 1], [], []>} : vector<16x64xf32>, vector<64x128xf32>, vector<16x128xf32> -> vector<16x128xf32>
    %62 = vector.broadcast %4 : vector<1x128xf32> to vector<16x128xf32>
    %63 = arith.addf %61, %62 : vector<16x128xf32>
    %c0_17 = arith.constant 0 : index
    %c0_18 = arith.constant 0 : index
    %64 = vector.load %arg2[%c0_17, %c0_18] : memref<16x128xf32, #tpu.memory_space<vmem>>, vector<16x128xf32>
    tpu.vector_store %arg2[%c0_17, %c0_18], %63 {strides = array<i32>} : memref<16x128xf32, #tpu.memory_space<vmem>>, vector<16x128xf32>,
    return
  }
}

</mosaic_0001>

<bundles_post_ra>
// kernel: simple_rnn_forward.1
= control target key start
LH: loop header
LB: loop body
LE: loop exit
PB: predicated region body
PF: predicated region fallthrough
CT: control target
= control target key end

     0   :  { %7 = vsyncpa [#allocation3], 0  ;;  %s498_s12 = smov [#allocation2]   ;;  %s499_s14 = smov 128   ;;  %s613_s0 = inlined_call_operand.vmem [shape: f32[16,4], index: 0, kind: input, shape index: {}]   ;;  %s614_s1 = inlined_call_operand.hbm [shape: f32[152,128], index: 1, kind: input, shape index: {}]   ;;  %s615_s2 = inlined_call_operand.vmem [shape: f32[16,128], index: 2, kind: output, shape index: {}]  }
   0x1   :  { %s14_s11 = sshll.u32 %s614_s1, 4  ;;  %s16_s13 = sshll.u32 %s498_s12, 4  ;;  %s15_s11 = int_to_ptr.hbm [resolvable:$true] %s14_s11  ;;  %s17_s13 = int_to_ptr.vmem [resolvable:$true] %s16_s13 }
   0x2   :  { %s500_s15 = smov 8  }
   0x3   :  { %22 = dma.hbm_to_vmem [thread:$0]  %s15_s11, 2432, %s17_s13, [#allocation3], %s499_s14, %s499_s14, %s500_s15  }
   0x4   :  { %496 = dma.done.wait [#allocation3], 2432  }
   0x5   :  { %497 = vsyncadd [#allocation3], 4294964864  ;;  %v520_v0 = vld [vmem:[#allocation2 + $0x40] sm:$0xff]  ;;  %v522_v1 = vld [vmem:[#allocation2 + $0x38] sm:$0xff]  ;;  %vm56_vm0 = vcmask 1043456   ;;  %vm49_vm1 = vcmask 31744  }
   0x6   :  { %95 = vmatpush.msra.mxu2 %v520_v0  ;;  %164 = vmatpush.msra.mxu3 %v520_v0  ;;  %v526_v2 = vld [vmem:[#allocation2 + $0x30] sm:$0xff]  ;;  %v27_v3 = vld [vmem:[#allocation2] sm:$0xf]  ;;  %v534_v5 = vld [vmem:[#allocation2 + $0x28] sm:$0xff]  ;;  %v501_v11 = vmov 0.0   ;;  %vm118_vm2 = vcmask 1041409  }
   0x7   :  { %v46_v4 = vld [vmem:[%s613_s0] sm:$0xff]  ;;  %236 = vmatpush.msra.mxu1 %v520_v0  ;;  %422 = vmatpush.msk.msra.mxu0 %vm56_vm0, %v27_v3  ;;  %v30_v7 = vld [vmem:[#allocation2 + $0x18] sm:$0xff]  ;;  %v47_v8 = vld [vmem:[%s613_s0 + $0x8] sm:$0xff]  ;;  %vm83_vm3 = vcmask 523264   ;;  %vm365_vm4 = vcmask 1040384   ;;  %vm368_vm5 = vcmask 1041408  }
   0x8   :  { %96 = vmatpush.msra.mxu2 %v522_v1  ;;  %423 = vmatmul.msk.f32.vlgmr.msra.gmra.mxu0 %vm49_vm1, %v46_v4  ;;  %v31_v6 = vld [vmem:[#allocation2 + $0x20] sm:$0xff]  ;;  %v29_v9 = vld [vmem:[#allocation2 + $0x10] sm:$0xff]  ;;  %v28_v10 = vld [vmem:[#allocation2 + $0x8] sm:$0xff]  ;;  %vm371_vm6 = vcmask 1042432   ;;  %vm376_vm7 = vcmask 1044480   ;;  %vm379_vm8 = vcmask 1045504  }
   0x9   :  { %165 = vmatpush.msra.mxu3 %v522_v1  ;;  %200 = vmatpush.msrb.mxu0 %v520_v0  ;;  %v438_v14 = vld [vmem:[#allocation2 + $0x48] ss:$0 sm:$0xff]  ;;  %vm382_vm9 = vcmask 1046528  }
   0xa   :  { %97 = vmatpush.msra.mxu2 %v526_v2  ;;  %237 = vmatpush.msra.mxu1 %v522_v1 }
   0xb   :  { %166 = vmatpush.msra.mxu3 %v526_v2  ;;  %201 = vmatpush.msrb.mxu0 %v522_v1 }
   0xc   :  { %98 = vmatpush.msra.mxu2 %v534_v5  ;;  %238 = vmatpush.msra.mxu1 %v526_v2 }
   0xd   :  { %167 = vmatpush.msra.mxu3 %v534_v5  ;;  %202 = vmatpush.msrb.mxu0 %v526_v2 }
   0xe   :  { %99 = vmatpush.msra.mxu2 %v31_v6  ;;  %239 = vmatpush.msra.mxu1 %v534_v5 }
   0xf   :  { %168 = vmatpush.msra.mxu3 %v31_v6  ;;  %203 = vmatpush.msrb.mxu0 %v534_v5 }
  0x10   :  { %100 = vmatpush.msra.mxu2 %v30_v7  ;;  %424 = vmatmul.msk.f32.gmra.mxu0 %vm49_vm1, %v47_v8 }
  0x11   :  { %169 = vmatpush.msra.mxu3 %v30_v7  ;;  %204 = vmatpush.msrb.mxu0 %v31_v6 }
  0x12   :  { %101 = vmatpush.msra.mxu2 %v29_v9  ;;  %240 = vmatpush.msra.mxu1 %v31_v6 }
  0x13   :  { %170 = vmatpush.msra.mxu3 %v29_v9  ;;  %205 = vmatpush.msrb.mxu0 %v30_v7 }
  0x14   :  { %102 = vmatpush.msra.mxu2 %v28_v10  ;;  %241 = vmatpush.msra.mxu1 %v30_v7 }
  0x15   :  { %103 = vmatmul.f32.vlgmr.msra.gmra.mxu2 %v501_v11  ;;  %171 = vmatpush.msra.mxu3 %v28_v10 }
  0x16   :  { %130 = vmatpush.msrb.mxu2 %v520_v0  ;;  %206 = vmatpush.msrb.mxu0 %v29_v9 }
  0x17   :  { %308 = vmatpush.msrb.mxu3 %v520_v0  ;;  %242 = vmatpush.msra.mxu1 %v29_v9 }
  0x18   :  { %131 = vmatpush.msrb.mxu2 %v522_v1  ;;  %207 = vmatpush.msrb.mxu0 %v28_v10 }
  0x19   :  { %309 = vmatpush.msrb.mxu3 %v522_v1  ;;  %243 = vmatpush.msra.mxu1 %v28_v10 }
  0x1a   :  { %132 = vmatpush.msrb.mxu2 %v526_v2  ;;  %344 = vmatpush.msra.mxu0 %v520_v0 }
  0x1b   :  { %310 = vmatpush.msrb.mxu3 %v526_v2 }
  0x1c   :  { %133 = vmatpush.msrb.mxu2 %v534_v5  ;;  %345 = vmatpush.msra.mxu0 %v522_v1 }
  0x1d   :  { %311 = vmatpush.msrb.mxu3 %v534_v5 }
  0x1e   :  { %134 = vmatpush.msrb.mxu2 %v31_v6  ;;  %346 = vmatpush.msra.mxu0 %v526_v2 }
  0x1f   :  { %312 = vmatpush.msrb.mxu3 %v31_v6 }
  0x20   :  { %135 = vmatpush.msrb.mxu2 %v30_v7  ;;  %347 = vmatpush.msra.mxu0 %v534_v5 }
  0x21   :  { %313 = vmatpush.msrb.mxu3 %v30_v7 }
  0x22   :  { %136 = vmatpush.msrb.mxu2 %v29_v9  ;;  %348 = vmatpush.msra.mxu0 %v31_v6 }
  0x23   :  { %314 = vmatpush.msrb.mxu3 %v29_v9 }
  0x24   :  { %137 = vmatpush.msrb.mxu2 %v28_v10  ;;  %349 = vmatpush.msra.mxu0 %v30_v7 }
  0x25   :  { %315 = vmatpush.msrb.mxu3 %v28_v10 }
  0x26   :  { %272 = vmatpush.msra.mxu2 %v520_v0  ;;  %350 = vmatpush.msra.mxu0 %v29_v9 }
  0x28   :  { %273 = vmatpush.msra.mxu2 %v522_v1  ;;  %351 = vmatpush.msra.mxu0 %v28_v10 }
  0x2a   :  { %274 = vmatpush.msra.mxu2 %v526_v2 }
  0x2c   :  { %275 = vmatpush.msra.mxu2 %v534_v5 }
  0x2e   :  { %276 = vmatpush.msra.mxu2 %v31_v6 }
  0x30   :  { %277 = vmatpush.msra.mxu2 %v30_v7 }
  0x32   :  { %278 = vmatpush.msra.mxu2 %v29_v9 }
  0x34   :  { %279 = vmatpush.msra.mxu2 %v28_v10 }
  0x85   :  { %v77_v12 = vpop.f32.mrf.mxu0 }
  0x86   :  { %v571_v17 = vadd.f32 %v438_v14, %v77_v12 }
  0x8d   :  { %v80_v13 = vpop.f32.mrf.mxu0 }
  0x8e   :  { %v569_v15 = vadd.f32 %v438_v14, %v80_v13 }
  0x98   :  { %v104_v16 = vpop.f32.mrf.mxu2 }
  0x99   :  { %v108_v18 = vrot.slane %v104_v16, 1  ;;  %v111_v19 = vadd.f32 %v104_v16, %v571_v17 }
  0x9b   :  { %v112_v20 = vadd.f32 %v108_v18, %v569_v15 }
  0x9d   :  { %440 = vtanh.f32 %v112_v20 }
  0x9e   :  { %442 = vtanh.f32 %v111_v19 }
  0xa3   :  { %v441_v21 = vpop.eup %440 }
  0xa4   :  { %v117_v22 = vrot.slane %v441_v21, 7  ;;  %v443_v23 = vpop.eup %442 }
  0xa6   :  { %v119_v24 = vsel %vm118_vm2, %v117_v22, %v443_v23 }
  0xa7   :  { %425 = vmatmul.msk.f32.vlgmr.msrb.gmra.mxu2 %vm83_vm3, %v119_v24 }
 0x12a   :  { %v139_v25 = vpop.f32.mrf.mxu2 }
 0x12b   :  { %v143_v26 = vrot.slane %v139_v25, 7  ;;  %v147_v28 = vadd.f32 %v139_v25, %v569_v15 }
 0x12d   :  { %v146_v27 = vadd.f32 %v143_v26, %v571_v17 }
 0x12f   :  { %444 = vtanh.f32 %v146_v27 }
 0x130   :  { %446 = vtanh.f32 %v147_v28 }
 0x135   :  { %v445_v29 = vpop.eup %444 }
 0x136   :  { %v152_v30 = vrot.slane %v445_v29, 1  ;;  %v447_v31 = vpop.eup %446  ;;  %v366_v39 = vsel %vm365_vm4, %v443_v23, %v445_v29 }
 0x137   :  { %v367_v43 = vsel %vm365_vm4, %v441_v21, %v447_v31  ;;  %v44_v21 = vld [vmem:[#allocation2 + $0x88] sm:$0xff] }
 0x138   :  { %v153_v32 = vsel %vm118_vm2, %v447_v31, %v152_v30  ;;  %400 = vmatpush.msrb.mxu1 %v44_v21 }
 0x139   :  { %426 = vmatmul.msk.f32.vlgmr.msra.gmra.mxu3 %vm83_vm3, %v153_v32 }
 0x1bc   :  { %v173_v33 = vpop.f32.mrf.mxu3 }
 0x1bd   :  { %v177_v34 = vrot.slane %v173_v33, 6  ;;  %v178_v35 = vrot.slane %v173_v33, 7 }
 0x1bf   :  { %v181_v36 = vadd.f32 %v177_v34, %v571_v17  ;;  %v182_v37 = vadd.f32 %v178_v35, %v569_v15  ;;  %v43_v34 = vld [vmem:[#allocation2 + $0x80] sm:$0xff]  ;;  %v42_v35 = vld [vmem:[#allocation2 + $0x78] sm:$0xff] }
 0x1c0   :  { %401 = vmatpush.msrb.mxu1 %v43_v34 }
 0x1c1   :  { %448 = vtanh.f32 %v181_v36  ;;  %v41_v36 = vld [vmem:[#allocation2 + $0x70] sm:$0xff] }
 0x1c2   :  { %450 = vtanh.f32 %v182_v37  ;;  %402 = vmatpush.msrb.mxu1 %v42_v35  ;;  %v40_v37 = vld [vmem:[#allocation2 + $0x68] sm:$0xff] }
 0x1c4   :  { %403 = vmatpush.msrb.mxu1 %v41_v36 }
 0x1c6   :  { %404 = vmatpush.msrb.mxu1 %v40_v37 }
 0x1c7   :  { %v449_v38 = vpop.eup %448 }
 0x1c8   :  { %v451_v40 = vpop.eup %450  ;;  %v187_v41 = vrot.slane %v449_v38, 2  ;;  %v369_v42 = vsel %vm368_vm5, %v366_v39, %v449_v38  ;;  %v39_v38 = vld [vmem:[#allocation2 + $0x60] sm:$0xff]  ;;  %v38_v39 = vld [vmem:[#allocation2 + $0x58] sm:$0xff] }
 0x1c9   :  { %v188_v44 = vrot.slane %v451_v40, 1  ;;  %v370_v45 = vsel %vm368_vm5, %v367_v43, %v451_v40  ;;  %405 = vmatpush.msrb.mxu1 %v39_v38  ;;  %v37_v40 = vld [vmem:[#allocation2 + $0x50] sm:$0xff] }
 0x1cb   :  { %v189_v46 = vsel %vm118_vm2, %v188_v44, %v187_v41  ;;  %406 = vmatpush.msrb.mxu1 %v38_v39 }
 0x1cc   :  { %427 = vmatmul.msk.f32.vlgmr.msrb.gmra.mxu0 %vm83_vm3, %v189_v46 }
 0x1cd   :  { %407 = vmatpush.msrb.mxu1 %v37_v40 }
 0x249   :  { %v209_v47 = vpop.f32.mrf.mxu0 }
 0x24a   :  { %v213_v48 = vrot.slane %v209_v47, 5  ;;  %v214_v49 = vrot.slane %v209_v47, 6 }
 0x24c   :  { %v217_v50 = vadd.f32 %v213_v48, %v571_v17  ;;  %v218_v51 = vadd.f32 %v214_v49, %v569_v15 }
 0x24e   :  { %452 = vtanh.f32 %v217_v50  ;;  %v439_v50 = vld [vmem:[#allocation2 + $0x90] ss:$0 sm:$0xff] }
 0x24f   :  { %454 = vtanh.f32 %v218_v51 }
 0x254   :  { %v453_v52 = vpop.eup %452 }
 0x255   :  { %v455_v53 = vpop.eup %454  ;;  %v223_v54 = vrot.slane %v453_v52, 3  ;;  %v372_v55 = vsel %vm371_vm6, %v369_v42, %v453_v52 }
 0x256   :  { %v224_v56 = vrot.slane %v455_v53, 2  ;;  %v373_v57 = vsel %vm371_vm6, %v370_v45, %v455_v53 }
 0x258   :  { %v225_v58 = vsel %vm118_vm2, %v224_v56, %v223_v54 }
 0x259   :  { %428 = vmatmul.msk.f32.vlgmr.msra.gmra.mxu1 %vm83_vm3, %v225_v58 }
 0x2d6   :  { %v245_v59 = vpop.f32.mrf.mxu1 }
 0x2d7   :  { %v249_v60 = vrot.slane %v245_v59, 4  ;;  %v250_v61 = vrot.slane %v245_v59, 5 }
 0x2d9   :  { %v253_v62 = vadd.f32 %v249_v60, %v571_v17  ;;  %v254_v63 = vadd.f32 %v250_v61, %v569_v15 }
 0x2db   :  { %456 = vtanh.f32 %v253_v62 }
 0x2dc   :  { %458 = vtanh.f32 %v254_v63 }
 0x2e1   :  { %v457_v0 = vpop.eup %456 }
 0x2e2   :  { %v459_v1 = vpop.eup %458  ;;  %v259_v2 = vrot.slane %v457_v0, 4  ;;  %v374_v3 = vsel %vm56_vm0, %v372_v55, %v457_v0 }
 0x2e3   :  { %v260_v4 = vrot.slane %v459_v1, 3  ;;  %v375_v5 = vsel %vm56_vm0, %v373_v57, %v459_v1 }
 0x2e5   :  { %v261_v6 = vsel %vm118_vm2, %v260_v4, %v259_v2 }
 0x2e6   :  { %429 = vmatmul.msk.f32.vlgmr.msra.gmra.mxu2 %vm83_vm3, %v261_v6 }
 0x369   :  { %v281_v7 = vpop.f32.mrf.mxu2 }
 0x36a   :  { %v285_v8 = vrot.slane %v281_v7, 3  ;;  %v286_v9 = vrot.slane %v281_v7, 4 }
 0x36c   :  { %v289_v10 = vadd.f32 %v285_v8, %v571_v17  ;;  %v290_v11 = vadd.f32 %v286_v9, %v569_v15 }
 0x36e   :  { %460 = vtanh.f32 %v289_v10 }
 0x36f   :  { %462 = vtanh.f32 %v290_v11 }
 0x374   :  { %v461_v12 = vpop.eup %460 }
 0x375   :  { %v463_v13 = vpop.eup %462  ;;  %v295_v14 = vrot.slane %v461_v12, 5  ;;  %v377_v16 = vsel %vm376_vm7, %v374_v3, %v461_v12 }
 0x376   :  { %v296_v18 = vrot.slane %v463_v13, 4  ;;  %v378_v19 = vsel %vm376_vm7, %v375_v5, %v463_v13 }
 0x378   :  { %v297_v20 = vsel %vm118_vm2, %v296_v18, %v295_v14 }
 0x379   :  { %430 = vmatmul.msk.f32.vlgmr.msrb.gmra.mxu3 %vm83_vm3, %v297_v20 }
 0x3fc   :  { %v317_v22 = vpop.f32.mrf.mxu3 }
 0x3fd   :  { %v321_v23 = vrot.slane %v317_v22, 2  ;;  %v322_v24 = vrot.slane %v317_v22, 3 }
 0x3ff   :  { %v325_v25 = vadd.f32 %v321_v23, %v571_v17  ;;  %v326_v26 = vadd.f32 %v322_v24, %v569_v15 }
 0x401   :  { %464 = vtanh.f32 %v325_v25 }
 0x402   :  { %466 = vtanh.f32 %v326_v26 }
 0x407   :  { %v465_v27 = vpop.eup %464 }
 0x408   :  { %v467_v28 = vpop.eup %466  ;;  %v331_v29 = vrot.slane %v465_v27, 6  ;;  %v380_v30 = vsel %vm379_vm8, %v377_v16, %v465_v27 }
 0x409   :  { %v332_v31 = vrot.slane %v467_v28, 5  ;;  %v381_v32 = vsel %vm379_vm8, %v378_v19, %v467_v28 }
 0x40b   :  { %v333_v33 = vsel %vm118_vm2, %v332_v31, %v331_v29 }
 0x40c   :  { %431 = vmatmul.msk.f32.vlgmr.msra.gmra.mxu0 %vm83_vm3, %v333_v33 }
 0x489   :  { %v353_v41 = vpop.f32.mrf.mxu0 }
 0x48a   :  { %v357_v42 = vrot.slane %v353_v41, 1  ;;  %v358_v43 = vrot.slane %v353_v41, 2 }
 0x48c   :  { %v361_v44 = vadd.f32 %v357_v42, %v571_v17  ;;  %v362_v45 = vadd.f32 %v358_v43, %v569_v15 }
 0x48e   :  { %468 = vtanh.f32 %v361_v44 }
 0x48f   :  { %470 = vtanh.f32 %v362_v45 }
 0x494   :  { %v469_v46 = vpop.eup %468 }
 0x495   :  { %v383_v47 = vsel %vm382_vm9, %v380_v30, %v469_v46  ;;  %v471_v48 = vpop.eup %470 }
 0x496   :  { %432 = vmatmul.msk.f32.vlgmr.msrb.gmra.mxu1 %vm83_vm3, %v383_v47  ;;  %v384_v49 = vsel %vm382_vm9, %v381_v32, %v471_v48 }
 0x49e   :  { %433 = vmatmul.msk.f32.gmra.mxu1 %vm83_vm3, %v384_v49 }
 0x513   :  { %v409_v51 = vpop.f32.mrf.mxu1 }
 0x514   :  { %v410_v52 = vadd.f32 %v439_v50, %v409_v51 }
 0x516   :  { %415 = vst [vmem:[%s615_s2] sm:$0xff] %v410_v52 }
 0x51b   :  { %v412_v17 = vpop.f32.mrf.mxu1 }
 0x51c   :  { %v413_v53 = vadd.f32 %v439_v50, %v412_v17 }
 0x51e   :  { %416 = vst [vmem:[%s615_s2 + $0x8] sm:$0xff] %v413_v53 }
 0x51f   :  { %421 = vsyncpa [#allocation3], 1 }

</bundles_post_ra>
